<compile_context>
chip_gen: v5e
topology: v5e:2x2
jax: 0.10.0
libtpu: 0.0.40
codegen_flags: <defaults>
</compile_context>

<pallas_src>
import jax
import jax.numpy as jnp
from jax import lax
from jax.experimental import pallas as pl
from jax.experimental.pallas import tpu as pltpu


# ---------------------------------------------------------------------------
# Pallas kernels
# ---------------------------------------------------------------------------

def _make_branch0_kernel(N, HW, C, G, eps=1e-5):
    """Fused Conv3x3(pad=1) + GroupNorm(G) + ReLU + Conv1x1 (whole batch)."""
    cpg = C // G
    cnt = float(HW * cpg)

    def kernel(taps_ref, w3_ref, b3_ref, gamma_ref, beta_ref, w1_ref, b1_ref,
               o_ref):
        # 3x3 conv as a single fused matmul over all 9 taps: (C, 9C) @ (9C, N*HW)
        acc = jnp.dot(w3_ref[...], taps_ref[...],
                      preferred_element_type=jnp.float32) + b3_ref[...]

        gamma = gamma_ref[...]      # (C, 1)
        beta = beta_ref[...]        # (C, 1)

        # GroupNorm + ReLU, per sample (N, G static & small -> unrolled by trace).
        # Per-sample lane slices are HW-aligned (HW is a multiple of 128 here).
        h_cols = []
        for n in range(N):
            a = acc[:, n * HW:(n + 1) * HW]                   # (C, HW)
            s1 = jnp.sum(a, axis=1, keepdims=True)            # (C, 1)
            s2 = jnp.sum(a * a, axis=1, keepdims=True)        # (C, 1)
            sc_rows = []
            bi_rows = []
            for g in range(G):                                # contiguous groups
                lo, hi = g * cpg, (g + 1) * cpg
                mean_g = jnp.sum(s1[lo:hi, :]) / cnt          # scalar
                ex2_g = jnp.sum(s2[lo:hi, :]) / cnt           # scalar
                inv_g = lax.rsqrt(ex2_g - mean_g * mean_g + eps)
                sc = gamma[lo:hi, :] * inv_g                  # (cpg, 1)
                bi = beta[lo:hi, :] - mean_g * sc             # (cpg, 1)
                sc_rows.append(sc)
                bi_rows.append(bi)
            scale_c = jnp.concatenate(sc_rows, axis=0)        # (C, 1)
            bias_c = jnp.concatenate(bi_rows, axis=0)         # (C, 1)
            # Fused normalize + affine + ReLU for this sample (lane broadcast).
            h_cols.append(jnp.maximum(a * scale_c + bias_c, 0.0))
        h = jnp.concatenate(h_cols, axis=1)                   # (C, N*HW)

        # 1x1 conv as one matmul over the whole lane-dense slab.
        out = jnp.dot(w1_ref[...], h,
                      preferred_element_type=jnp.float32) + b1_ref[...]
        o_ref[...] = out.astype(o_ref.dtype)

    return kernel


def _down_kernel(taps_ref, w3_ref, b3_ref, w1_ref, b1_ref, o_ref):
    """Fused Conv3x3(pad=1, stride=2) + ReLU + Conv1x1 (whole batch)."""
    acc = jnp.dot(w3_ref[...], taps_ref[...],
                  preferred_element_type=jnp.float32) + b3_ref[...]
    h = jnp.maximum(acc, 0.0)
    out = jnp.dot(w1_ref[...], h,
                  preferred_element_type=jnp.float32) + b1_ref[...]
    o_ref[...] = out.astype(o_ref.dtype)


# ---------------------------------------------------------------------------
# Glue: channel-major im2col taps (indexing only; compute stays in kernels)
# ---------------------------------------------------------------------------

def _taps_cf(x_cnhw, stride):
    """Return taps (Cin*9, N*Ho*Wo) matching w.reshape(Cout, Cin*3*3) ordering."""
    C, N, H, W = x_cnhw.shape
    Ho = (H - 1) // stride + 1
    Wo = (W - 1) // stride + 1
    xp = jnp.pad(x_cnhw, ((0, 0), (0, 0), (1, 1), (1, 1)))
    taps = []
    for dy in range(3):
        for dx in range(3):
            taps.append(xp[:, :, dy:dy + stride * (Ho - 1) + 1:stride,
                               dx:dx + stride * (Wo - 1) + 1:stride])
    t = jnp.stack(taps, axis=1)                       # (C, 9, N, Ho, Wo)
    return t.reshape(C * 9, N * Ho * Wo), Ho, Wo


def _full(shape):
    return pl.BlockSpec(shape, lambda i, _n=len(shape): (0,) * _n)


def branch0_apply(x_cnhw, p, num_groups=4):
    C, N, H, W = x_cnhw.shape
    taps, Ho, Wo = _taps_cf(x_cnhw, stride=1)
    HW = Ho * Wo
    kernel = _make_branch0_kernel(N, HW, C, num_groups)
    out = pl.pallas_call(
        kernel,
        out_shape=jax.ShapeDtypeStruct((C, N * HW), jnp.float32),
        grid=(1,),
        in_specs=[
            _full((C * 9, N * HW)),   # taps
            _full((C, C * 9)),        # w3 (fused, taps on contraction axis)
            _full((C, 1)),            # b3
            _full((C, 1)),            # gamma
            _full((C, 1)),            # beta
            _full((C, C)),            # w1
            _full((C, 1)),            # b1
        ],
        out_specs=_full((C, N * HW)),
        compiler_params=pltpu.CompilerParams(dimension_semantics=("arbitrary",)),
    )(taps, p["w3"], p["b3"], p["gamma"], p["beta"], p["w1"], p["b1"])
    return out.reshape(C, N, Ho, Wo)


def down_apply(x_cnhw, p):
    Cin, N, H, W = x_cnhw.shape
    Cout = p["w3"].shape[0]
    taps, Ho, Wo = _taps_cf(x_cnhw, stride=2)
    HW = Ho * Wo
    out = pl.pallas_call(
        _down_kernel,
        out_shape=jax.ShapeDtypeStruct((Cout, N * HW), jnp.float32),
        grid=(1,),
        in_specs=[
            _full((Cin * 9, N * HW)),  # taps
            _full((Cout, Cin * 9)),    # w3 (fused)
            _full((Cout, 1)),          # b3
            _full((Cout, Cout)),       # w1
            _full((Cout, 1)),          # b1
        ],
        out_specs=_full((Cout, N * HW)),
        compiler_params=pltpu.CompilerParams(dimension_semantics=("arbitrary",)),
    )(taps, p["w3"], p["b3"], p["w1"], p["b1"])
    return out.reshape(Cout, N, Ho, Wo)


# ---------------------------------------------------------------------------
# Parameter setup (deterministic, synthetic) and forward pass
# ---------------------------------------------------------------------------

def init_params(num_channels, key):
    nb = len(num_channels)
    C0 = num_channels[0]
    keys = iter(jax.random.split(key, 4 * nb + 8))

    def nrm(shape, scale=0.1):
        return scale * jax.random.normal(next(keys), shape, dtype=jnp.float32)

    # Branch 0: Conv3x3(C0->C0) -> GroupNorm(4, C0) -> ReLU -> Conv1x1(C0->C0)
    w3_oihw = nrm((C0, C0, 3, 3))
    b3 = nrm((C0,))
    gamma = 1.0 + nrm((C0,))
    beta = nrm((C0,))
    w1_oihw = nrm((C0, C0, 1, 1))
    b1 = nrm((C0,))

    branch0 = dict(
        torch=dict(w3=w3_oihw, b3=b3, gamma=gamma, beta=beta, w1=w1_oihw, b1=b1),
        w3=w3_oihw.reshape(C0, C0 * 9),   # (Cout, Cin*3*3) — matches tap order
        b3=b3.reshape(C0, 1),
        gamma=gamma.reshape(C0, 1),
        beta=beta.reshape(C0, 1),
        w1=w1_oihw[:, :, 0, 0],           # (Cout, Cin)
        b1=b1.reshape(C0, 1),
    )

    downs = []
    for bi in range(1, nb):
        Ci, Co = num_channels[bi - 1], num_channels[bi]
        w3_oihw = nrm((Co, Ci, 3, 3))
        b3 = nrm((Co,))
        w1_oihw = nrm((Co, Co, 1, 1))
        b1 = nrm((Co,))
        downs.append(dict(
            torch=dict(w3=w3_oihw, b3=b3, w1=w1_oihw, b1=b1),
            w3=w3_oihw.reshape(Co, Ci * 9),
            b3=b3.reshape(Co, 1),
            w1=w1_oihw[:, :, 0, 0],
            b1=b1.reshape(Co, 1),
        ))
    return dict(branch0=branch0, downs=downs)


def multiscale_initializer_forward(x_nchw, params):
    x_cn = jnp.transpose(x_nchw, (1, 0, 2, 3))            # NCHW -> (C, N, H, W)
    outs = [branch0_apply(x_cn, params["branch0"])]
    for p in params["downs"]:
        outs.append(down_apply(outs[-1], p))
    return [jnp.transpose(o, (1, 0, 2, 3)) for o in outs]  # back to NCHW


# ---------------------------------------------------------------------------
# Pure-JAX reference (for correctness check only)
# ---------------------------------------------------------------------------

def _ref_forward(x_nchw, params, G=4, eps=1e-5):
    def conv(x, w, b, stride, pad):
        y = lax.conv_general_dilated(
            x, w, window_strides=(stride, stride),
            padding=((pad, pad), (pad, pad)),
            dimension_numbers=("NCHW", "OIHW", "NCHW"))
        return y + b[None, :, None, None]

    def groupnorm(y, gamma, beta):
        N, C, H, W = y.shape
        yg = y.reshape(N, G, C // G, H, W)
        mean = jnp.mean(yg, axis=(2, 3, 4), keepdims=True)
        var = jnp.var(yg, axis=(2, 3, 4), keepdims=True)
        yn = ((yg - mean) / jnp.sqrt(var + eps)).reshape(N, C, H, W)
        return yn * gamma[None, :, None, None] + beta[None, :, None, None]

    p0 = params["branch0"]["torch"]
    y = conv(x_nchw, p0["w3"], p0["b3"], 1, 1)
    y = groupnorm(y, p0["gamma"], p0["beta"])
    y = jnp.maximum(y, 0.0)
    y = conv(y, p0["w1"], p0["b1"], 1, 0)
    outs = [y]
    for p in params["downs"]:
        pt = p["torch"]
        y = conv(outs[-1], pt["w3"], pt["b3"], 2, 1)
        y = jnp.maximum(y, 0.0)
        y = conv(y, pt["w1"], pt["b1"], 1, 0)
        outs.append(y)
    return outs


if __name__ == "__main__":
    num_channels = [8, 16, 32]
    key = jax.random.PRNGKey(0)
    kx, kp = jax.random.split(key)
    x = jax.random.normal(kx, (2, num_channels[0], 16, 16), dtype=jnp.float32)  # NCHW

    params = init_params(num_channels, kp)
    outs = multiscale_initializer_forward(x, params)
    outs = [jax.block_until_ready(o) for o in outs]

    refs = _ref_forward(x, params)
    for o, r in zip(outs, refs):
        assert o.shape == r.shape and o.dtype == r.dtype, (o.shape, r.shape)
        err = float(jnp.max(jnp.abs(o - r)))
        assert err < 1e-3, err

    print("KERNEL_OK")
</pallas_src>

<mosaic_0001>
module attributes {stable_mosaic.version = 11 : i64} {
  func.func @kernel(%arg0: i32, %arg1: memref<72x512xf32, #tpu.memory_space<vmem>>, %arg2: memref<8x72xf32, #tpu.memory_space<vmem>>, %arg3: memref<8x1xf32, #tpu.memory_space<vmem>>, %arg4: memref<8x1xf32, #tpu.memory_space<vmem>>, %arg5: memref<8x1xf32, #tpu.memory_space<vmem>>, %arg6: memref<8x8xf32, #tpu.memory_space<vmem>>, %arg7: memref<8x1xf32, #tpu.memory_space<vmem>>, %arg8: memref<8x512xf32, #tpu.memory_space<vmem>>) attributes {dimension_semantics = [#tpu.dimension_semantics<arbitrary>], iteration_bounds = array<i64: 1>, scalar_prefetch = 0 : i64, scratch_operands = 0 : i64, tpu.core_type = #tpu.core_type<tc>, window_params = [{pipeline_mode = #tpu.pipeline_mode<synchronous>, transform_indices = @transform_0, window_bounds = array<i64: 72, 512>}, {pipeline_mode = #tpu.pipeline_mode<synchronous>, transform_indices = @transform_1, window_bounds = array<i64: 8, 72>}, {pipeline_mode = #tpu.pipeline_mode<synchronous>, transform_indices = @transform_2, window_bounds = array<i64: 8, 1>}, {pipeline_mode = #tpu.pipeline_mode<synchronous>, transform_indices = @transform_3, window_bounds = array<i64: 8, 1>}, {pipeline_mode = #tpu.pipeline_mode<synchronous>, transform_indices = @transform_4, window_bounds = array<i64: 8, 1>}, {pipeline_mode = #tpu.pipeline_mode<synchronous>, transform_indices = @transform_5, window_bounds = array<i64: 8, 8>}, {pipeline_mode = #tpu.pipeline_mode<synchronous>, transform_indices = @transform_6, window_bounds = array<i64: 8, 1>}, {pipeline_mode = #tpu.pipeline_mode<synchronous>, transform_indices = @transform_7, window_bounds = array<i64: 8, 512>}]} {
    %c0 = arith.constant 0 : index
    %c0_0 = arith.constant 0 : index
    %0 = vector.load %arg2[%c0, %c0_0] : memref<8x72xf32, #tpu.memory_space<vmem>>, vector<8x72xf32>
    %c0_1 = arith.constant 0 : index
    %c0_2 = arith.constant 0 : index
    %1 = vector.load %arg1[%c0_1, %c0_2] : memref<72x512xf32, #tpu.memory_space<vmem>>, vector<72x512xf32>
    %cst = arith.constant dense<0.000000e+00> : vector<8x512xf32>
    %2 = tpu.matmul %0, %1, %cst {dimension_numbers = #tpu.dot_dimension_numbers<[1], [0], [0], [1], [0, 0, 1, 1], [], []>} : vector<8x72xf32>, vector<72x512xf32>, vector<8x512xf32> -> vector<8x512xf32>
    %c0_3 = arith.constant 0 : index
    %c0_4 = arith.constant 0 : index
    %3 = vector.load %arg3[%c0_3, %c0_4] : memref<8x1xf32, #tpu.memory_space<vmem>>, vector<8x1xf32>
    %4 = vector.broadcast %3 : vector<8x1xf32> to vector<8x512xf32>
    %5 = arith.addf %2, %4 : vector<8x512xf32>
    %c0_5 = arith.constant 0 : index
    %c0_6 = arith.constant 0 : index
    %6 = vector.load %arg4[%c0_5, %c0_6] : memref<8x1xf32, #tpu.memory_space<vmem>>, vector<8x1xf32>
    %c0_7 = arith.constant 0 : index
    %c0_8 = arith.constant 0 : index
    %7 = vector.load %arg5[%c0_7, %c0_8] : memref<8x1xf32, #tpu.memory_space<vmem>>, vector<8x1xf32>
    %8 = vector.extract_strided_slice %5 {offsets = [0, 0], sizes = [8, 256], strides = [1, 1]} : vector<8x512xf32> to vector<8x256xf32>
    %cst_9 = arith.constant dense<0.000000e+00> : vector<8xf32>
    %9 = vector.multi_reduction <add>, %8, %cst_9 [1] : vector<8x256xf32> to vector<8xf32>
    %10 = vector.shape_cast %9 : vector<8xf32> to vector<8x1xf32>
    %11 = arith.mulf %8, %8 : vector<8x256xf32>
    %cst_10 = arith.constant dense<0.000000e+00> : vector<8xf32>
    %12 = vector.multi_reduction <add>, %11, %cst_10 [1] : vector<8x256xf32> to vector<8xf32>
    %13 = vector.shape_cast %12 : vector<8xf32> to vector<8x1xf32>
    %14 = vector.extract_strided_slice %10 {offsets = [0, 0], sizes = [2, 1], strides = [1, 1]} : vector<8x1xf32> to vector<2x1xf32>
    %15 = vector.shape_cast %14 : vector<2x1xf32> to vector<1x2x1xf32>
    %cst_11 = arith.constant dense<0.000000e+00> : vector<1xf32>
    %16 = vector.multi_reduction <add>, %15, %cst_11 [1, 2] : vector<1x2x1xf32> to vector<1xf32>
    %17 = vector.shape_cast %16 : vector<1xf32> to vector<1x1x1xf32>
    %18 = vector.extract %17[0, 0, 0] : f32 from vector<1x1x1xf32>
    %cst_12 = arith.constant 5.120000e+02 : f32
    %19 = arith.divf %18, %cst_12 : f32
    %20 = vector.extract_strided_slice %13 {offsets = [0, 0], sizes = [2, 1], strides = [1, 1]} : vector<8x1xf32> to vector<2x1xf32>
    %21 = vector.shape_cast %20 : vector<2x1xf32> to vector<1x2x1xf32>
    %cst_13 = arith.constant dense<0.000000e+00> : vector<1xf32>
    %22 = vector.multi_reduction <add>, %21, %cst_13 [1, 2] : vector<1x2x1xf32> to vector<1xf32>
    %23 = vector.shape_cast %22 : vector<1xf32> to vector<1x1x1xf32>
    %24 = vector.extract %23[0, 0, 0] : f32 from vector<1x1x1xf32>
    %cst_14 = arith.constant 5.120000e+02 : f32
    %25 = arith.divf %24, %cst_14 : f32
    %26 = arith.mulf %19, %19 : f32
    %27 = arith.subf %25, %26 : f32
    %cst_15 = arith.constant 9.99999974E-6 : f32
    %28 = arith.addf %27, %cst_15 : f32
    %29 = math.rsqrt %28 : f32
    %30 = vector.extract_strided_slice %6 {offsets = [0, 0], sizes = [2, 1], strides = [1, 1]} : vector<8x1xf32> to vector<2x1xf32>
    %31 = vector.broadcast %29 : f32 to vector<2x1xf32>
    %32 = arith.mulf %30, %31 : vector<2x1xf32>
    %33 = vector.extract_strided_slice %7 {offsets = [0, 0], sizes = [2, 1], strides = [1, 1]} : vector<8x1xf32> to vector<2x1xf32>
    %34 = vector.broadcast %19 : f32 to vector<2x1xf32>
    %35 = arith.mulf %34, %32 : vector<2x1xf32>
    %36 = arith.subf %33, %35 : vector<2x1xf32>
    %37 = vector.extract_strided_slice %10 {offsets = [2, 0], sizes = [2, 1], strides = [1, 1]} : vector<8x1xf32> to vector<2x1xf32>
    %38 = vector.shape_cast %37 : vector<2x1xf32> to vector<1x2x1xf32>
    %cst_16 = arith.constant dense<0.000000e+00> : vector<1xf32>
    %39 = vector.multi_reduction <add>, %38, %cst_16 [1, 2] : vector<1x2x1xf32> to vector<1xf32>
    %40 = vector.shape_cast %39 : vector<1xf32> to vector<1x1x1xf32>
    %41 = vector.extract %40[0, 0, 0] : f32 from vector<1x1x1xf32>
    %cst_17 = arith.constant 5.120000e+02 : f32
    %42 = arith.divf %41, %cst_17 : f32
    %43 = vector.extract_strided_slice %13 {offsets = [2, 0], sizes = [2, 1], strides = [1, 1]} : vector<8x1xf32> to vector<2x1xf32>
    %44 = vector.shape_cast %43 : vector<2x1xf32> to vector<1x2x1xf32>
    %cst_18 = arith.constant dense<0.000000e+00> : vector<1xf32>
    %45 = vector.multi_reduction <add>, %44, %cst_18 [1, 2] : vector<1x2x1xf32> to vector<1xf32>
    %46 = vector.shape_cast %45 : vector<1xf32> to vector<1x1x1xf32>
    %47 = vector.extract %46[0, 0, 0] : f32 from vector<1x1x1xf32>
    %cst_19 = arith.constant 5.120000e+02 : f32
    %48 = arith.divf %47, %cst_19 : f32
    %49 = arith.mulf %42, %42 : f32
    %50 = arith.subf %48, %49 : f32
    %cst_20 = arith.constant 9.99999974E-6 : f32
    %51 = arith.addf %50, %cst_20 : f32
    %52 = math.rsqrt %51 : f32
    %53 = vector.extract_strided_slice %6 {offsets = [2, 0], sizes = [2, 1], strides = [1, 1]} : vector<8x1xf32> to vector<2x1xf32>
    %54 = vector.broadcast %52 : f32 to vector<2x1xf32>
    %55 = arith.mulf %53, %54 : vector<2x1xf32>
    %56 = vector.extract_strided_slice %7 {offsets = [2, 0], sizes = [2, 1], strides = [1, 1]} : vector<8x1xf32> to vector<2x1xf32>
    %57 = vector.broadcast %42 : f32 to vector<2x1xf32>
    %58 = arith.mulf %57, %55 : vector<2x1xf32>
    %59 = arith.subf %56, %58 : vector<2x1xf32>
    %60 = vector.extract_strided_slice %10 {offsets = [4, 0], sizes = [2, 1], strides = [1, 1]} : vector<8x1xf32> to vector<2x1xf32>
    %61 = vector.shape_cast %60 : vector<2x1xf32> to vector<1x2x1xf32>
    %cst_21 = arith.constant dense<0.000000e+00> : vector<1xf32>
    %62 = vector.multi_reduction <add>, %61, %cst_21 [1, 2] : vector<1x2x1xf32> to vector<1xf32>
    %63 = vector.shape_cast %62 : vector<1xf32> to vector<1x1x1xf32>
    %64 = vector.extract %63[0, 0, 0] : f32 from vector<1x1x1xf32>
    %cst_22 = arith.constant 5.120000e+02 : f32
    %65 = arith.divf %64, %cst_22 : f32
    %66 = vector.extract_strided_slice %13 {offsets = [4, 0], sizes = [2, 1], strides = [1, 1]} : vector<8x1xf32> to vector<2x1xf32>
    %67 = vector.shape_cast %66 : vector<2x1xf32> to vector<1x2x1xf32>
    %cst_23 = arith.constant dense<0.000000e+00> : vector<1xf32>
    %68 = vector.multi_reduction <add>, %67, %cst_23 [1, 2] : vector<1x2x1xf32> to vector<1xf32>
    %69 = vector.shape_cast %68 : vector<1xf32> to vector<1x1x1xf32>
    %70 = vector.extract %69[0, 0, 0] : f32 from vector<1x1x1xf32>
    %cst_24 = arith.constant 5.120000e+02 : f32
    %71 = arith.divf %70, %cst_24 : f32
    %72 = arith.mulf %65, %65 : f32
    %73 = arith.subf %71, %72 : f32
    %cst_25 = arith.constant 9.99999974E-6 : f32
    %74 = arith.addf %73, %cst_25 : f32
    %75 = math.rsqrt %74 : f32
    %76 = vector.extract_strided_slice %6 {offsets = [4, 0], sizes = [2, 1], strides = [1, 1]} : vector<8x1xf32> to vector<2x1xf32>
    %77 = vector.broadcast %75 : f32 to vector<2x1xf32>
    %78 = arith.mulf %76, %77 : vector<2x1xf32>
    %79 = vector.extract_strided_slice %7 {offsets = [4, 0], sizes = [2, 1], strides = [1, 1]} : vector<8x1xf32> to vector<2x1xf32>
    %80 = vector.broadcast %65 : f32 to vector<2x1xf32>
    %81 = arith.mulf %80, %78 : vector<2x1xf32>
    %82 = arith.subf %79, %81 : vector<2x1xf32>
    %83 = vector.extract_strided_slice %10 {offsets = [6, 0], sizes = [2, 1], strides = [1, 1]} : vector<8x1xf32> to vector<2x1xf32>
    %84 = vector.shape_cast %83 : vector<2x1xf32> to vector<1x2x1xf32>
    %cst_26 = arith.constant dense<0.000000e+00> : vector<1xf32>
    %85 = vector.multi_reduction <add>, %84, %cst_26 [1, 2] : vector<1x2x1xf32> to vector<1xf32>
    %86 = vector.shape_cast %85 : vector<1xf32> to vector<1x1x1xf32>
    %87 = vector.extract %86[0, 0, 0] : f32 from vector<1x1x1xf32>
    %cst_27 = arith.constant 5.120000e+02 : f32
    %88 = arith.divf %87, %cst_27 : f32
    %89 = vector.extract_strided_slice %13 {offsets = [6, 0], sizes = [2, 1], strides = [1, 1]} : vector<8x1xf32> to vector<2x1xf32>
    %90 = vector.shape_cast %89 : vector<2x1xf32> to vector<1x2x1xf32>
    %cst_28 = arith.constant dense<0.000000e+00> : vector<1xf32>
    %91 = vector.multi_reduction <add>, %90, %cst_28 [1, 2] : vector<1x2x1xf32> to vector<1xf32>
    %92 = vector.shape_cast %91 : vector<1xf32> to vector<1x1x1xf32>
    %93 = vector.extract %92[0, 0, 0] : f32 from vector<1x1x1xf32>
    %cst_29 = arith.constant 5.120000e+02 : f32
    %94 = arith.divf %93, %cst_29 : f32
    %95 = arith.mulf %88, %88 : f32
    %96 = arith.subf %94, %95 : f32
    %cst_30 = arith.constant 9.99999974E-6 : f32
    %97 = arith.addf %96, %cst_30 : f32
    %98 = math.rsqrt %97 : f32
    %99 = vector.extract_strided_slice %6 {offsets = [6, 0], sizes = [2, 1], strides = [1, 1]} : vector<8x1xf32> to vector<2x1xf32>
    %100 = vector.broadcast %98 : f32 to vector<2x1xf32>
    %101 = arith.mulf %99, %100 : vector<2x1xf32>
    %102 = vector.extract_strided_slice %7 {offsets = [6, 0], sizes = [2, 1], strides = [1, 1]} : vector<8x1xf32> to vector<2x1xf32>
    %103 = vector.broadcast %88 : f32 to vector<2x1xf32>
    %104 = arith.mulf %103, %101 : vector<2x1xf32>
    %105 = arith.subf %102, %104 : vector<2x1xf32>
    %106 = tpu.concatenate %32, %55, %78, %101 in 0 : vector<2x1xf32>, vector<2x1xf32>, vector<2x1xf32>, vector<2x1xf32> -> vector<8x1xf32>
    %107 = tpu.concatenate %36, %59, %82, %105 in 0 : vector<2x1xf32>, vector<2x1xf32>, vector<2x1xf32>, vector<2x1xf32> -> vector<8x1xf32>
    %108 = vector.broadcast %106 : vector<8x1xf32> to vector<8x256xf32>
    %109 = arith.mulf %8, %108 : vector<8x256xf32>
    %110 = vector.broadcast %107 : vector<8x1xf32> to vector<8x256xf32>
    %111 = arith.addf %109, %110 : vector<8x256xf32>
    %cst_31 = arith.constant 0.000000e+00 : f32
    %112 = vector.broadcast %cst_31 : f32 to vector<8x256xf32>
    %113 = arith.maximumf %111, %112 : vector<8x256xf32>
    %114 = vector.extract_strided_slice %5 {offsets = [0, 256], sizes = [8, 256], strides = [1, 1]} : vector<8x512xf32> to vector<8x256xf32>
    %cst_32 = arith.constant dense<0.000000e+00> : vector<8xf32>
    %115 = vector.multi_reduction <add>, %114, %cst_32 [1] : vector<8x256xf32> to vector<8xf32>
    %116 = vector.shape_cast %115 : vector<8xf32> to vector<8x1xf32>
    %117 = arith.mulf %114, %114 : vector<8x256xf32>
    %cst_33 = arith.constant dense<0.000000e+00> : vector<8xf32>
    %118 = vector.multi_reduction <add>, %117, %cst_33 [1] : vector<8x256xf32> to vector<8xf32>
    %119 = vector.shape_cast %118 : vector<8xf32> to vector<8x1xf32>
    %120 = vector.extract_strided_slice %116 {offsets = [0, 0], sizes = [2, 1], strides = [1, 1]} : vector<8x1xf32> to vector<2x1xf32>
    %121 = vector.shape_cast %120 : vector<2x1xf32> to vector<1x2x1xf32>
    %cst_34 = arith.constant dense<0.000000e+00> : vector<1xf32>
    %122 = vector.multi_reduction <add>, %121, %cst_34 [1, 2] : vector<1x2x1xf32> to vector<1xf32>
    %123 = vector.shape_cast %122 : vector<1xf32> to vector<1x1x1xf32>
    %124 = vector.extract %123[0, 0, 0] : f32 from vector<1x1x1xf32>
    %cst_35 = arith.constant 5.120000e+02 : f32
    %125 = arith.divf %124, %cst_35 : f32
    %126 = vector.extract_strided_slice %119 {offsets = [0, 0], sizes = [2, 1], strides = [1, 1]} : vector<8x1xf32> to vector<2x1xf32>
    %127 = vector.shape_cast %126 : vector<2x1xf32> to vector<1x2x1xf32>
    %cst_36 = arith.constant dense<0.000000e+00> : vector<1xf32>
    %128 = vector.multi_reduction <add>, %127, %cst_36 [1, 2] : vector<1x2x1xf32> to vector<1xf32>
    %129 = vector.shape_cast %128 : vector<1xf32> to vector<1x1x1xf32>
    %130 = vector.extract %129[0, 0, 0] : f32 from vector<1x1x1xf32>
    %cst_37 = arith.constant 5.120000e+02 : f32
    %131 = arith.divf %130, %cst_37 : f32
    %132 = arith.mulf %125, %125 : f32
    %133 = arith.subf %131, %132 : f32
    %cst_38 = arith.constant 9.99999974E-6 : f32
    %134 = arith.addf %133, %cst_38 : f32
    %135 = math.rsqrt %134 : f32
    %136 = vector.extract_strided_slice %6 {offsets = [0, 0], sizes = [2, 1], strides = [1, 1]} : vector<8x1xf32> to vector<2x1xf32>
    %137 = vector.broadcast %135 : f32 to vector<2x1xf32>
    %138 = arith.mulf %136, %137 : vector<2x1xf32>
    %139 = vector.extract_strided_slice %7 {offsets = [0, 0], sizes = [2, 1], strides = [1, 1]} : vector<8x1xf32> to vector<2x1xf32>
    %140 = vector.broadcast %125 : f32 to vector<2x1xf32>
    %141 = arith.mulf %140, %138 : vector<2x1xf32>
    %142 = arith.subf %139, %141 : vector<2x1xf32>
    %143 = vector.extract_strided_slice %116 {offsets = [2, 0], sizes = [2, 1], strides = [1, 1]} : vector<8x1xf32> to vector<2x1xf32>
    %144 = vector.shape_cast %143 : vector<2x1xf32> to vector<1x2x1xf32>
    %cst_39 = arith.constant dense<0.000000e+00> : vector<1xf32>
    %145 = vector.multi_reduction <add>, %144, %cst_39 [1, 2] : vector<1x2x1xf32> to vector<1xf32>
    %146 = vector.shape_cast %145 : vector<1xf32> to vector<1x1x1xf32>
    %147 = vector.extract %146[0, 0, 0] : f32 from vector<1x1x1xf32>
    %cst_40 = arith.constant 5.120000e+02 : f32
    %148 = arith.divf %147, %cst_40 : f32
    %149 = vector.extract_strided_slice %119 {offsets = [2, 0], sizes = [2, 1], strides = [1, 1]} : vector<8x1xf32> to vector<2x1xf32>
    %150 = vector.shape_cast %149 : vector<2x1xf32> to vector<1x2x1xf32>
    %cst_41 = arith.constant dense<0.000000e+00> : vector<1xf32>
    %151 = vector.multi_reduction <add>, %150, %cst_41 [1, 2] : vector<1x2x1xf32> to vector<1xf32>
    %152 = vector.shape_cast %151 : vector<1xf32> to vector<1x1x1xf32>
    %153 = vector.extract %152[0, 0, 0] : f32 from vector<1x1x1xf32>
    %cst_42 = arith.constant 5.120000e+02 : f32
    %154 = arith.divf %153, %cst_42 : f32
    %155 = arith.mulf %148, %148 : f32
    %156 = arith.subf %154, %155 : f32
    %cst_43 = arith.constant 9.99999974E-6 : f32
    %157 = arith.addf %156, %cst_43 : f32
    %158 = math.rsqrt %157 : f32
    %159 = vector.extract_strided_slice %6 {offsets = [2, 0], sizes = [2, 1], strides = [1, 1]} : vector<8x1xf32> to vector<2x1xf32>
    %160 = vector.broadcast %158 : f32 to vector<2x1xf32>
    %161 = arith.mulf %159, %160 : vector<2x1xf32>
    %162 = vector.extract_strided_slice %7 {offsets = [2, 0], sizes = [2, 1], strides = [1, 1]} : vector<8x1xf32> to vector<2x1xf32>
    %163 = vector.broadcast %148 : f32 to vector<2x1xf32>
    %164 = arith.mulf %163, %161 : vector<2x1xf32>
    %165 = arith.subf %162, %164 : vector<2x1xf32>
    %166 = vector.extract_strided_slice %116 {offsets = [4, 0], sizes = [2, 1], strides = [1, 1]} : vector<8x1xf32> to vector<2x1xf32>
    %167 = vector.shape_cast %166 : vector<2x1xf32> to vector<1x2x1xf32>
    %cst_44 = arith.constant dense<0.000000e+00> : vector<1xf32>
    %168 = vector.multi_reduction <add>, %167, %cst_44 [1, 2] : vector<1x2x1xf32> to vector<1xf32>
    %169 = vector.shape_cast %168 : vector<1xf32> to vector<1x1x1xf32>
    %170 = vector.extract %169[0, 0, 0] : f32 from vector<1x1x1xf32>
    %cst_45 = arith.constant 5.120000e+02 : f32
    %171 = arith.divf %170, %cst_45 : f32
    %172 = vector.extract_strided_slice %119 {offsets = [4, 0], sizes = [2, 1], strides = [1, 1]} : vector<8x1xf32> to vector<2x1xf32>
    %173 = vector.shape_cast %172 : vector<2x1xf32> to vector<1x2x1xf32>
    %cst_46 = arith.constant dense<0.000000e+00> : vector<1xf32>
    %174 = vector.multi_reduction <add>, %173, %cst_46 [1, 2] : vector<1x2x1xf32> to vector<1xf32>
    %175 = vector.shape_cast %174 : vector<1xf32> to vector<1x1x1xf32>
    %176 = vector.extract %175[0, 0, 0] : f32 from vector<1x1x1xf32>
    %cst_47 = arith.constant 5.120000e+02 : f32
    %177 = arith.divf %176, %cst_47 : f32
    %178 = arith.mulf %171, %171 : f32
    %179 = arith.subf %177, %178 : f32
    %cst_48 = arith.constant 9.99999974E-6 : f32
    %180 = arith.addf %179, %cst_48 : f32
    %181 = math.rsqrt %180 : f32
    %182 = vector.extract_strided_slice %6 {offsets = [4, 0], sizes = [2, 1], strides = [1, 1]} : vector<8x1xf32> to vector<2x1xf32>
    %183 = vector.broadcast %181 : f32 to vector<2x1xf32>
    %184 = arith.mulf %182, %183 : vector<2x1xf32>
    %185 = vector.extract_strided_slice %7 {offsets = [4, 0], sizes = [2, 1], strides = [1, 1]} : vector<8x1xf32> to vector<2x1xf32>
    %186 = vector.broadcast %171 : f32 to vector<2x1xf32>
    %187 = arith.mulf %186, %184 : vector<2x1xf32>
    %188 = arith.subf %185, %187 : vector<2x1xf32>
    %189 = vector.extract_strided_slice %116 {offsets = [6, 0], sizes = [2, 1], strides = [1, 1]} : vector<8x1xf32> to vector<2x1xf32>
    %190 = vector.shape_cast %189 : vector<2x1xf32> to vector<1x2x1xf32>
    %cst_49 = arith.constant dense<0.000000e+00> : vector<1xf32>
    %191 = vector.multi_reduction <add>, %190, %cst_49 [1, 2] : vector<1x2x1xf32> to vector<1xf32>
    %192 = vector.shape_cast %191 : vector<1xf32> to vector<1x1x1xf32>
    %193 = vector.extract %192[0, 0, 0] : f32 from vector<1x1x1xf32>
    %cst_50 = arith.constant 5.120000e+02 : f32
    %194 = arith.divf %193, %cst_50 : f32
    %195 = vector.extract_strided_slice %119 {offsets = [6, 0], sizes = [2, 1], strides = [1, 1]} : vector<8x1xf32> to vector<2x1xf32>
    %196 = vector.shape_cast %195 : vector<2x1xf32> to vector<1x2x1xf32>
    %cst_51 = arith.constant dense<0.000000e+00> : vector<1xf32>
    %197 = vector.multi_reduction <add>, %196, %cst_51 [1, 2] : vector<1x2x1xf32> to vector<1xf32>
    %198 = vector.shape_cast %197 : vector<1xf32> to vector<1x1x1xf32>
    %199 = vector.extract %198[0, 0, 0] : f32 from vector<1x1x1xf32>
    %cst_52 = arith.constant 5.120000e+02 : f32
    %200 = arith.divf %199, %cst_52 : f32
    %201 = arith.mulf %194, %194 : f32
    %202 = arith.subf %200, %201 : f32
    %cst_53 = arith.constant 9.99999974E-6 : f32
    %203 = arith.addf %202, %cst_53 : f32
    %204 = math.rsqrt %203 : f32
    %205 = vector.extract_strided_slice %6 {offsets = [6, 0], sizes = [2, 1], strides = [1, 1]} : vector<8x1xf32> to vector<2x1xf32>
    %206 = vector.broadcast %204 : f32 to vector<2x1xf32>
    %207 = arith.mulf %205, %206 : vector<2x1xf32>
    %208 = vector.extract_strided_slice %7 {offsets = [6, 0], sizes = [2, 1], strides = [1, 1]} : vector<8x1xf32> to vector<2x1xf32>
    %209 = vector.broadcast %194 : f32 to vector<2x1xf32>
    %210 = arith.mulf %209, %207 : vector<2x1xf32>
    %211 = arith.subf %208, %210 : vector<2x1xf32>
    %212 = tpu.concatenate %138, %161, %184, %207 in 0 : vector<2x1xf32>, vector<2x1xf32>, vector<2x1xf32>, vector<2x1xf32> -> vector<8x1xf32>
    %213 = tpu.concatenate %142, %165, %188, %211 in 0 : vector<2x1xf32>, vector<2x1xf32>, vector<2x1xf32>, vector<2x1xf32> -> vector<8x1xf32>
    %214 = vector.broadcast %212 : vector<8x1xf32> to vector<8x256xf32>
    %215 = arith.mulf %114, %214 : vector<8x256xf32>
    %216 = vector.broadcast %213 : vector<8x1xf32> to vector<8x256xf32>
    %217 = arith.addf %215, %216 : vector<8x256xf32>
    %cst_54 = arith.constant 0.000000e+00 : f32
    %218 = vector.broadcast %cst_54 : f32 to vector<8x256xf32>
    %219 = arith.maximumf %217, %218 : vector<8x256xf32>
    %220 = tpu.concatenate %113, %219 in 1 : vector<8x256xf32>, vector<8x256xf32> -> vector<8x512xf32>
    %c0_55 = arith.constant 0 : index
    %c0_56 = arith.constant 0 : index
    %221 = vector.load %arg6[%c0_55, %c0_56] : memref<8x8xf32, #tpu.memory_space<vmem>>, vector<8x8xf32>
    %cst_57 = arith.constant dense<0.000000e+00> : vector<8x512xf32>
    %222 = tpu.matmul %221, %220, %cst_57 {dimension_numbers = #tpu.dot_dimension_numbers<[1], [0], [0], [1], [0, 0, 1, 1], [], []>} : vector<8x8xf32>, vector<8x512xf32>, vector<8x512xf32> -> vector<8x512xf32>
    %c0_58 = arith.constant 0 : index
    %c0_59 = arith.constant 0 : index
    %223 = vector.load %arg7[%c0_58, %c0_59] : memref<8x1xf32, #tpu.memory_space<vmem>>, vector<8x1xf32>
    %224 = vector.broadcast %223 : vector<8x1xf32> to vector<8x512xf32>
    %225 = arith.addf %222, %224 : vector<8x512xf32>
    %c0_60 = arith.constant 0 : index
    %c0_61 = arith.constant 0 : index
    %226 = vector.load %arg8[%c0_60, %c0_61] : memref<8x512xf32, #tpu.memory_space<vmem>>, vector<8x512xf32>
    tpu.vector_store %arg8[%c0_60, %c0_61], %225 {strides = array<i32>} : memref<8x512xf32, #tpu.memory_space<vmem>>, vector<8x512xf32>,
    return
  }
  func.func @transform_0(%arg0: i32) -> (i32, i32) {
    %c0_i32 = arith.constant 0 : i32
    %c0_i32_0 = arith.constant 0 : i32
    %c0_i32_1 = arith.constant 0 : i32
    return %c0_i32, %c0_i32_0 : i32, i32
  }
  func.func @transform_1(%arg0: i32) -> (i32, i32) {
    %c0_i32 = arith.constant 0 : i32
    %c0_i32_0 = arith.constant 0 : i32
    %c0_i32_1 = arith.constant 0 : i32
    return %c0_i32, %c0_i32_0 : i32, i32
  }
  func.func @transform_2(%arg0: i32) -> (i32, i32) {
    %c0_i32 = arith.constant 0 : i32
    %c0_i32_0 = arith.constant 0 : i32
    %c0_i32_1 = arith.constant 0 : i32
    return %c0_i32, %c0_i32_0 : i32, i32
  }
  func.func @transform_3(%arg0: i32) -> (i32, i32) {
    %c0_i32 = arith.constant 0 : i32
    %c0_i32_0 = arith.constant 0 : i32
    %c0_i32_1 = arith.constant 0 : i32
    return %c0_i32, %c0_i32_0 : i32, i32
  }
  func.func @transform_4(%arg0: i32) -> (i32, i32) {
    %c0_i32 = arith.constant 0 : i32
    %c0_i32_0 = arith.constant 0 : i32
    %c0_i32_1 = arith.constant 0 : i32
    return %c0_i32, %c0_i32_0 : i32, i32
  }
  func.func @transform_5(%arg0: i32) -> (i32, i32) {
    %c0_i32 = arith.constant 0 : i32
    %c0_i32_0 = arith.constant 0 : i32
    %c0_i32_1 = arith.constant 0 : i32
    return %c0_i32, %c0_i32_0 : i32, i32
  }
  func.func @transform_6(%arg0: i32) -> (i32, i32) {
    %c0_i32 = arith.constant 0 : i32
    %c0_i32_0 = arith.constant 0 : i32
    %c0_i32_1 = arith.constant 0 : i32
    return %c0_i32, %c0_i32_0 : i32, i32
  }
  func.func @transform_7(%arg0: i32) -> (i32, i32) {
    %c0_i32 = arith.constant 0 : i32
    %c0_i32_0 = arith.constant 0 : i32
    %c0_i32_1 = arith.constant 0 : i32
    return %c0_i32, %c0_i32_0 : i32, i32
  }
}

</mosaic_0001>

<bundles_post_ra>
// kernel: tpu_custom_call.1
= control target key start
LH: loop header
LB: loop body
LE: loop exit
PB: predicated region body
PF: predicated region fallthrough
CT: control target
= control target key end

     0   :  { %12 = vsyncpa [#allocation3], 0  ;;  %s1198_s0 = inlined_call_operand.hbm [shape: f32[72,512], index: 0, kind: input, shape index: {}]   ;;  %s1199_s1 = inlined_call_operand.vmem [shape: f32[8,72], index: 1, kind: input, shape index: {}]   ;;  %s1200_s2 = inlined_call_operand.vmem [shape: f32[8,1], index: 2, kind: input, shape index: {}]   ;;  %s1201_s3 = inlined_call_operand.vmem [shape: f32[8,1], index: 3, kind: input, shape index: {}]   ;;  %s1202_s4 = inlined_call_operand.vmem [shape: f32[8,1], index: 4, kind: input, shape index: {}]   ;;  %s1203_s5 = inlined_call_operand.vmem [shape: f32[8,8], index: 5, kind: input, shape index: {}]   ;;  %s1204_s6 = inlined_call_operand.vmem [shape: f32[8,1], index: 6, kind: input, shape index: {}]   ;;  %s1205_s7 = inlined_call_operand.hbm [shape: f32[8,512], index: 7, kind: output, shape index: {}]  }
   0x1   :  { %13 = vsyncpa [#allocation4], 0  ;;  %s18_s26 = sshll.u32 %s1198_s0, 4  ;;  %s977_s27 = smov [#allocation2]   ;;  %s19_s26 = int_to_ptr.hbm [resolvable:$true] %s18_s26 }
   0x2   :  { %s20_s28 = sshll.u32 %s977_s27, 4  ;;  %s978_s29 = smov 512   ;;  %s21_s28 = int_to_ptr.vmem [resolvable:$true] %s20_s28 }
   0x3   :  { %s979_s30 = smov 32  }
   0x4   :  { %26 = dma.hbm_to_vmem [thread:$0]  %s19_s26, 4608, %s21_s28, [#allocation3], %s978_s29, %s978_s29, %s979_s30  }
   0x5   :  { %973 = dma.done.wait [#allocation3], 4608  }
   0x6   :  { %974 = vsyncadd [#allocation3], 4294962688  ;;  %v980_v0 = vmov 0   ;;  %v76_v1 = vld [vmem:[#allocation2 + $0x100] sm:$0xff]  ;;  %v77_v2 = vld [vmem:[#allocation2 + $0x108] sm:$0xff]  ;;  %vm86_vm0 = vcmask 588800  }
   0x7   :  { %904 = vset.pattern.permute.xlu0 %v980_v0  ;;  %906 = vset.pattern.permute.xlu1 %v980_v0  ;;  %v78_v3 = vld [vmem:[#allocation2 + $0x110] sm:$0xff]  ;;  %v79_v4 = vld [vmem:[#allocation2 + $0x118] sm:$0xff]  ;;  %v72_v5 = vld [vmem:[#allocation2 + $0xe0] sm:$0xff]  ;;  %vm180_vm1 = vcmask 1024   ;;  %vm427_vm9 = vcmask 1041408   ;;  %vm429_vm13 = vcmask 1043456  }
   0x8   :  { %905 = vset.pattern.permute.xlu2 %v980_v0  ;;  %97 = vmatpush.msra.mxu0 %v76_v1  ;;  %v73_v6 = vld [vmem:[#allocation2 + $0xe8] sm:$0xff]  ;;  %v74_v7 = vld [vmem:[#allocation2 + $0xf0] sm:$0xff]  ;;  %v75_v8 = vld [vmem:[#allocation2 + $0xf8] sm:$0xff] }
   0x9   :  { %117 = vmatpush.msra.mxu1 %v77_v2  ;;  %137 = vmatpush.msra.mxu2 %v78_v3  ;;  %v68_v9 = vld [vmem:[#allocation2 + $0xc0] sm:$0xff]  ;;  %v69_v10 = vld [vmem:[#allocation2 + $0xc8] sm:$0xff]  ;;  %v70_v11 = vld [vmem:[#allocation2 + $0xd0] sm:$0xff] }
   0xa   :  { %157 = vmatpush.msra.mxu3 %v79_v4  ;;  %98 = vmatpush.msra.mxu0 %v72_v5  ;;  %v71_v12 = vld [vmem:[#allocation2 + $0xd8] sm:$0xff]  ;;  %v64_v13 = vld [vmem:[#allocation2 + $0xa0] sm:$0xff]  ;;  %v65_v14 = vld [vmem:[#allocation2 + $0xa8] sm:$0xff] }
   0xb   :  { %118 = vmatpush.msra.mxu1 %v73_v6  ;;  %138 = vmatpush.msra.mxu2 %v74_v7  ;;  %v66_v15 = vld [vmem:[#allocation2 + $0xb0] sm:$0xff]  ;;  %v67_v16 = vld [vmem:[#allocation2 + $0xb8] sm:$0xff]  ;;  %v60_v17 = vld [vmem:[#allocation2 + $0x80] sm:$0xff] }
   0xc   :  { %158 = vmatpush.msra.mxu3 %v75_v8  ;;  %99 = vmatpush.msra.mxu0 %v68_v9  ;;  %v61_v18 = vld [vmem:[#allocation2 + $0x88] sm:$0xff]  ;;  %v62_v19 = vld [vmem:[#allocation2 + $0x90] sm:$0xff]  ;;  %v63_v20 = vld [vmem:[#allocation2 + $0x98] sm:$0xff]  ;;  %v981_v8 = vmov 512.0  }
   0xd   :  { %119 = vmatpush.msra.mxu1 %v69_v10  ;;  %139 = vmatpush.msra.mxu2 %v70_v11  ;;  %v56_v21 = vld [vmem:[#allocation2 + $0x60] sm:$0xff]  ;;  %v57_v22 = vld [vmem:[#allocation2 + $0x68] sm:$0xff]  ;;  %v58_v23 = vld [vmem:[#allocation2 + $0x70] sm:$0xff]  ;;  %907 = vrcp.f32 %v981_v8 }
   0xe   :  { %159 = vmatpush.msra.mxu3 %v71_v12  ;;  %100 = vmatpush.msra.mxu0 %v64_v13  ;;  %v59_v24 = vld [vmem:[#allocation2 + $0x78] sm:$0xff]  ;;  %v52_v25 = vld [vmem:[#allocation2 + $0x40] sm:$0xff]  ;;  %v53_v26 = vld [vmem:[#allocation2 + $0x48] sm:$0xff] }
   0xf   :  { %120 = vmatpush.msra.mxu1 %v65_v14  ;;  %140 = vmatpush.msra.mxu2 %v66_v15  ;;  %v54_v27 = vld [vmem:[#allocation2 + $0x50] sm:$0xff]  ;;  %v55_v28 = vld [vmem:[#allocation2 + $0x58] sm:$0xff]  ;;  %v48_v29 = vld [vmem:[#allocation2 + $0x20] sm:$0xff] }
  0x10   :  { %160 = vmatpush.msra.mxu3 %v67_v16  ;;  %101 = vmatpush.msra.mxu0 %v60_v17  ;;  %v49_v30 = vld [vmem:[#allocation2 + $0x28] sm:$0xff]  ;;  %v50_v31 = vld [vmem:[#allocation2 + $0x30] sm:$0xff]  ;;  %v51_v32 = vld [vmem:[#allocation2 + $0x38] sm:$0xff] }
  0x11   :  { %121 = vmatpush.msra.mxu1 %v61_v18  ;;  %141 = vmatpush.msra.mxu2 %v62_v19  ;;  %v44_v33 = vld [vmem:[#allocation2] sm:$0xff]  ;;  %v45_v34 = vld [vmem:[#allocation2 + $0x8] sm:$0xff]  ;;  %v46_v35 = vld [vmem:[#allocation2 + $0x10] sm:$0xff] }
  0x12   :  { %161 = vmatpush.msra.mxu3 %v63_v20  ;;  %102 = vmatpush.msra.mxu0 %v56_v21  ;;  %v47_v36 = vld [vmem:[#allocation2 + $0x18] sm:$0xff]  ;;  %v43_v37 = vld [vmem:[%s1199_s1] sm:$0xff] }
  0x13   :  { %122 = vmatpush.msra.mxu1 %v57_v22  ;;  %142 = vmatpush.msra.mxu2 %v58_v23  ;;  %v80_v38 = vld [vmem:[%s1200_s2] sm:$0xff]  ;;  %v908_v9 = vpop.eup %907 }
  0x14   :  { %162 = vmatpush.msra.mxu3 %v59_v24  ;;  %103 = vmatpush.msra.mxu0 %v52_v25  ;;  %v192_v10 = vmul.f32 512.0, %v908_v9  ;;  %vm196_vm2 = vweird.f32 %v908_v9 }
  0x15   :  { %123 = vmatpush.msra.mxu1 %v53_v26  ;;  %143 = vmatpush.msra.mxu2 %v54_v27 }
  0x16   :  { %163 = vmatpush.msra.mxu3 %v55_v28  ;;  %104 = vmatpush.msra.mxu0 %v48_v29  ;;  %v193_v11 = vsub.f32 1.0, %v192_v10 }
  0x17   :  { %124 = vmatpush.msra.mxu1 %v49_v30  ;;  %144 = vmatpush.msra.mxu2 %v50_v31 }
  0x18   :  { %164 = vmatpush.msra.mxu3 %v51_v32  ;;  %105 = vmatpush.msra.mxu0 %v44_v33  ;;  %v194_v17 = vmul.f32 %v908_v9, %v193_v11 }
  0x19   :  { %125 = vmatpush.msra.mxu1 %v45_v34  ;;  %145 = vmatpush.msra.mxu2 %v46_v35 }
  0x1a   :  { %165 = vmatpush.msra.mxu3 %v47_v36  ;;  %840 = vmatmul.msk.f32.vlgmr.msra.gmra.mxu0 %vm86_vm0, %v43_v37  ;;  %v195_v22 = vadd.f32 %v908_v9, %v194_v17 }
  0x1b   :  { %841 = vmatmul.msk.f32.vlgmr.msra.gmra.mxu1 %vm86_vm0, %v43_v37  ;;  %842 = vmatmul.msk.f32.vlgmr.msra.gmra.mxu2 %vm86_vm0, %v43_v37 }
  0x1c   :  { %843 = vmatmul.msk.f32.vlgmr.msra.gmra.mxu3 %vm86_vm0, %v43_v37  ;;  %83 = vperm.xlu0 %904, %v80_v38   ;;  %v197_v28 = vsel %vm196_vm2, %v908_v9, %v195_v22 }
  0x8e   :  { %v84_v39 = vpop.permute.xlu0 %83 }
  0x97   :  { %v107_v40 = vpop.f32.mrf.mxu0 }
  0x98   :  { %v127_v41 = vpop.f32.mrf.mxu1  ;;  %v1032_v42 = vadd.f32 %v107_v40, %v84_v39 }
  0x99   :  { %v1034_v43 = vadd.f32 %v127_v41, %v84_v39 }
  0x9a   :  { %v175_v45 = vmul.f32 %v1032_v42, %v1032_v42 }
  0x9b   :  { %v172_v44 = vadd.f32 %v1034_v43, %v1032_v42  ;;  %v176_v46 = vmul.f32 %v1034_v43, %v1034_v43 }
  0x9d   :  { %173 = vadd.xlane.f32.xlu0 %v172_v44  ;;  %v177_v47 = vadd.f32 %v176_v46, %v175_v45 }
  0x9e   :  { %v147_v60 = vpop.f32.mrf.mxu2 }
  0x9f   :  { %178 = vadd.xlane.f32.xlu1 %v177_v47  ;;  %v167_v61 = vpop.f32.mrf.mxu3  ;;  %v1048_v0 = vadd.f32 %v147_v60, %v84_v39 }
  0xa0   :  { %v1050_v1 = vadd.f32 %v167_v61, %v84_v39 }
  0xa1   :  { %v455_v4 = vmul.f32 %v1048_v0, %v1048_v0 }
  0xa2   :  { %v456_v5 = vmul.f32 %v1050_v1, %v1050_v1  ;;  %v452_v7 = vadd.f32 %v1050_v1, %v1048_v0 }
  0xa4   :  { %v457_v6 = vadd.f32 %v456_v5, %v455_v4 }
 0x110   :  { %v174_v48 = vpop.xlane.xlu0 %173 }
 0x111   :  { %v181_v49 = vsel %vm180_vm1, %v174_v48, 0.0  ;;  %v240_v53 = vrot.slane %v174_v48, 2  ;;  %v303_v57 = vrot.slane %v174_v48, 4  ;;  %v365_v63 = vrot.slane %v174_v48, 6 }
 0x112   :  { %v179_v50 = vpop.xlane.xlu1 %178  ;;  %182 = vadd.xlane.f32.xlu1 %v181_v49 }
 0x113   :  { %v200_v51 = vsel %vm180_vm1, %v179_v50, 0.0  ;;  %v262_v52 = vrot.slane %v179_v50, 2  ;;  %v242_v55 = vsel %vm180_vm1, %v240_v53, 0.0  ;;  %v324_v56 = vrot.slane %v179_v50, 4 }
 0x114   :  { %201 = vadd.xlane.f32.xlu2 %v200_v51  ;;  %v305_v59 = vsel %vm180_vm1, %v303_v57, 0.0  ;;  %v386_v62 = vrot.slane %v179_v50, 6  ;;  %v367_v3 = vsel %vm180_vm1, %v365_v63, 0.0 }
 0x115   :  { %v264_v54 = vsel %vm180_vm1, %v262_v52, 0.0  ;;  %v326_v58 = vsel %vm180_vm1, %v324_v56, 0.0 }
 0x116   :  { %v388_v2 = vsel %vm180_vm1, %v386_v62, 0.0 }
 0x11a   :  { %265 = vadd.xlane.f32.xlu1 %v264_v54 }
 0x11c   :  { %243 = vadd.xlane.f32.xlu2 %v242_v55 }
 0x122   :  { %327 = vadd.xlane.f32.xlu1 %v326_v58 }
 0x124   :  { %306 = vadd.xlane.f32.xlu2 %v305_v59 }
 0x12a   :  { %389 = vadd.xlane.f32.xlu1 %v388_v2 }
 0x12c   :  { %368 = vadd.xlane.f32.xlu2 %v367_v3 }
 0x132   :  { %458 = vadd.xlane.f32.xlu1 %v457_v6 }
 0x134   :  { %453 = vadd.xlane.f32.xlu2 %v452_v7 }
 0x185   :  { %v183_v12 = vpop.xlane.xlu1 %182 }
 0x186   :  { %v184_v13 = vrot.slane %v183_v12, 4 }
 0x187   :  { %v202_v14 = vpop.xlane.xlu2 %201 }
 0x188   :  { %v185_v15 = vadd.f32 %v184_v13, %v183_v12  ;;  %v203_v16 = vrot.slane %v202_v14, 4 }
 0x18a   :  { %v186_v18 = vrot.slane %v185_v15, 2  ;;  %v204_v19 = vadd.f32 %v203_v16, %v202_v14 }
 0x18c   :  { %v205_v20 = vrot.slane %v204_v19, 2  ;;  %v187_v21 = vadd.f32 %v186_v18, %v185_v15 }
 0x18d   :  { %v266_v23 = vpop.xlane.xlu1 %265 }
 0x18e   :  { %v188_v24 = vrot.slane %v187_v21, 1  ;;  %v206_v25 = vadd.f32 %v205_v20, %v204_v19  ;;  %v267_v54 = vrot.slane %v266_v23, 4 }
 0x18f   :  { %v244_v26 = vpop.xlane.xlu2 %243 }
 0x190   :  { %v189_v27 = vadd.f32 %v188_v24, %v187_v21  ;;  %v207_v29 = vrot.slane %v206_v25, 1  ;;  %v245_v53 = vrot.slane %v244_v26, 4  ;;  %v268_v57 = vadd.f32 %v267_v54, %v266_v23 }
 0x192   :  { %848 = vpush %v189_v27  ;;  %v208_v30 = vadd.f32 %v207_v29, %v206_v25  ;;  %v246_v56 = vadd.f32 %v245_v53, %v244_v26  ;;  %v269_v60 = vrot.slane %v268_v57, 2 }
 0x193   :  { %850 = vpush %v197_v28 }
 0x194   :  { %852 = vpush %v208_v30  ;;  %v247_v58 = vrot.slane %v246_v56, 2  ;;  %v270_v2 = vadd.f32 %v269_v60, %v268_v57 }
 0x195   :  { %v1060_v31 = vpop.xlane.xlu1 %327 }
 0x196   :  { %v248_v63 = vadd.f32 %v247_v58, %v246_v56  ;;  %v271_v6 = vrot.slane %v270_v2, 1  ;;  %v329_v12 = vrot.slane %v1060_v31, 4 }
 0x197   :  { %v1062_v32 = vpop.xlane.xlu2 %306 }
 0x198   :  { %v249_v5 = vrot.slane %v248_v63, 1  ;;  %v272_v10 = vadd.f32 %v271_v6, %v270_v2  ;;  %v308_v11 = vrot.slane %v1062_v32, 4  ;;  %v330_v15 = vadd.f32 %v329_v12, %v1060_v31  ;;  %v1099_v31 = vld [vmem:[%s1201_s3] sm:$0xff] }
 0x19a   :  { %v250_v9 = vadd.f32 %v249_v5, %v248_v63  ;;  %v309_v14 = vadd.f32 %v308_v11, %v1062_v32  ;;  %v331_v18 = vrot.slane %v330_v15, 2 }
 0x19c   :  { %v310_v16 = vrot.slane %v309_v14, 2  ;;  %v332_v22 = vadd.f32 %v331_v18, %v330_v15 }
 0x19d   :  { %v1064_v33 = vpop.xlane.xlu1 %389 }
 0x19e   :  { %v311_v21 = vadd.f32 %v310_v16, %v309_v14  ;;  %v333_v26 = vrot.slane %v332_v22, 1 }
 0x19f   :  { %v1066_v34 = vpop.xlane.xlu2 %368 }
 0x1a0   :  { %v312_v25 = vrot.slane %v311_v21, 1  ;;  %v334_v30 = vadd.f32 %v333_v26, %v332_v22 }
 0x1a2   :  { %v313_v29 = vadd.f32 %v312_v25, %v311_v21 }
 0x1a5   :  { %v459_v35 = vpop.xlane.xlu1 %458 }
 0x1a6   :  { %v479_v36 = vsel %vm180_vm1, %v459_v35, 0.0  ;;  %v541_v37 = vrot.slane %v459_v35, 2  ;;  %v665_v49 = vrot.slane %v459_v35, 6  ;;  %v603_v50 = vrot.slane %v459_v35, 4 }
 0x1a7   :  { %v454_v38 = vpop.xlane.xlu2 %453  ;;  %480 = vadd.xlane.f32.xlu1 %v479_v36 }
 0x1a8   :  { %v460_v39 = vsel %vm180_vm1, %v454_v38, 0.0  ;;  %v543_v40 = vsel %vm180_vm1, %v541_v37, 0.0  ;;  %v582_v41 = vrot.slane %v454_v38, 4  ;;  %v519_v44 = vrot.slane %v454_v38, 2 }
 0x1a9   :  { %461 = vadd.xlane.f32.xlu2 %v460_v39  ;;  %544 = vadd.xlane.f32.xlu0 %v543_v40  ;;  %v644_v45 = vrot.slane %v454_v38, 6  ;;  %v667_v51 = vsel %vm180_vm1, %v665_v49, 0.0  ;;  %v605_v52 = vsel %vm180_vm1, %v603_v50, 0.0  ;;  %v1111_v40 = vld [vmem:[%s1202_s4] sm:$0xff]  ;;  %v391_v49 = vrot.slane %v1064_v33, 4 }
 0x1aa   :  { %v584_v46 = vsel %vm180_vm1, %v582_v41, 0.0  ;;  %v521_v47 = vsel %vm180_vm1, %v519_v44, 0.0 }
 0x1ab   :  { %v646_v48 = vsel %vm180_vm1, %v644_v45, 0.0  ;;  %vm431_vm1 = vcmask 1045504  }
 0x1af   :  { %585 = vadd.xlane.f32.xlu1 %v584_v46 }
 0x1b1   :  { %522 = vadd.xlane.f32.xlu2 %v521_v47  ;;  %647 = vadd.xlane.f32.xlu0 %v646_v48  ;;  %v370_v47 = vrot.slane %v1066_v34, 4 }
 0x1b7   :  { %668 = vadd.xlane.f32.xlu1 %v667_v51  ;;  %v371_v51 = vadd.f32 %v370_v47, %v1066_v34 }
 0x1b9   :  { %606 = vadd.xlane.f32.xlu2 %v605_v52  ;;  %v392_v52 = vadd.f32 %v391_v49, %v1064_v33  ;;  %v372_v53 = vrot.slane %v371_v51, 2 }
 0x1bb   :  { %v373_v58 = vadd.f32 %v372_v53, %v371_v51 }
 0x1c3   :  { %s849_s1 = spop %848 }
 0x1c4   :  { %s1076_s2 = spop %850 }
 0x1c5   :  { %s1079_s11 = smul.f32 %s1076_s2, %s849_s1  ;;  %s853_s12 = spop %852 }
 0x1c6   :  { %s218_s13 = smul.f32 %s853_s12, %s1076_s2 }
 0x1c7   :  { %s219_s14 = smul.f32 %s1079_s11, %s1079_s11  ;;  %v236_v36 = vstv %s1079_s11 }
 0x1c9   :  { %s220_s15 = ssub.f32 %s218_s13, %s219_s14 }
 0x1cb   :  { %s221_s16 = sadd.f32 1e-05, %s220_s15 }
 0x1cd   :  { %v222_v55 = vstv %s221_s16 }
 0x1ce   :  { %909 = vrsqrt.f32 %v222_v55  ;;  %vm229_vm4 = vweird.f32 %v222_v55 }
 0x1d4   :  { %v910_v59 = vpop.eup %909 }
 0x1d5   :  { %v224_v61 = vmul.f32 %v910_v59, %v222_v55  ;;  %vm230_vm3 = vweird.f32 %v910_v59  ;;  %v393_v55 = vrot.slane %v392_v52, 2 }
 0x1d6   :  { %vm231_vm5 = vmor %vm229_vm4, %vm230_vm3 }
 0x1d7   :  { %v225_v62 = vmul.f32 %v910_v59, %v224_v61 }
 0x1d9   :  { %v226_v3 = vmul.f32 0.5, %v225_v62  ;;  %v374_v62 = vrot.slane %v373_v58, 1 }
 0x1db   :  { %v227_v4 = vsub.f32 1.5, %v226_v3  ;;  %v375_v33 = vadd.f32 %v374_v62, %v373_v58 }
 0x1dd   :  { %v228_v7 = vmul.f32 %v910_v59, %v227_v4 }
 0x1df   :  { %v232_v8 = vsel %vm231_vm5, %v910_v59, %v228_v7  ;;  %v394_v59 = vadd.f32 %v393_v55, %v392_v52 }
 0x1e0   :  { %854 = vpush %v232_v8 }
 0x1e1   :  { %856 = vpush %v250_v9  ;;  %v395_v63 = vrot.slane %v394_v59, 1 }
 0x1e2   :  { %858 = vpush %v272_v10 }
 0x1e3   :  { %v396_v3 = vadd.f32 %v395_v63, %v394_v59 }
 0x211   :  { %s1084_s17 = spop %854 }
 0x212   :  { %s857_s18 = spop %856  ;;  %v234_v32 = vstv %s1084_s17 }
 0x213   :  { %s1087_s19 = smul.f32 %s857_s18, %s1076_s2  ;;  %s859_s20 = spop %858  ;;  %v235_v35 = vmul.f32 %v234_v32, %v1099_v31 }
 0x214   :  { %s282_s21 = smul.f32 %s859_s20, %s1076_s2 }
 0x215   :  { %s283_s22 = smul.f32 %s1087_s19, %s1087_s19  ;;  %v237_v38 = vmul.f32 %v236_v36, %v235_v35  ;;  %v300_v41 = vstv %s1087_s19 }
 0x217   :  { %s284_s23 = ssub.f32 %s282_s21, %s283_s22  ;;  %v238_v45 = vsub.f32 %v1111_v40, %v237_v38 }
 0x219   :  { %s285_s24 = sadd.f32 1e-05, %s284_s23 }
 0x21a   :  { %v481_v11 = vpop.xlane.xlu1 %480 }
 0x21b   :  { %v286_v13 = vstv %s285_s24  ;;  %v482_v15 = vrot.slane %v481_v11, 4 }
 0x21c   :  { %911 = vrsqrt.f32 %v286_v13  ;;  %vm293_vm7 = vweird.f32 %v286_v13  ;;  %v462_v10 = vpop.xlane.xlu2 %461 }
 0x21d   :  { %v483_v18 = vadd.f32 %v482_v15, %v481_v11 }
 0x21f   :  { %v484_v21 = vrot.slane %v483_v18, 2 }
 0x221   :  { %v485_v25 = vadd.f32 %v484_v21, %v483_v18 }
 0x222   :  { %v912_v17 = vpop.eup %911 }
 0x223   :  { %v288_v19 = vmul.f32 %v912_v17, %v286_v13  ;;  %vm294_vm6 = vweird.f32 %v912_v17  ;;  %v463_v13 = vrot.slane %v462_v10, 4 }
 0x224   :  { %vm295_vm8 = vmor %vm293_vm7, %vm294_vm6 }
 0x225   :  { %v289_v20 = vmul.f32 %v912_v17, %v288_v19 }
 0x227   :  { %v290_v23 = vmul.f32 0.5, %v289_v20 }
 0x229   :  { %v291_v24 = vsub.f32 1.5, %v290_v23 }
 0x22b   :  { %v292_v27 = vmul.f32 %v912_v17, %v291_v24 }
 0x22d   :  { %v296_v28 = vsel %vm295_vm8, %v912_v17, %v292_v27  ;;  %v464_v17 = vadd.f32 %v463_v13, %v462_v10 }
 0x22e   :  { %860 = vpush %v296_v28 }
 0x22f   :  { %862 = vpush %v313_v29  ;;  %v465_v19 = vrot.slane %v464_v17, 2  ;;  %v486_v29 = vrot.slane %v485_v25, 1 }
 0x230   :  { %864 = vpush %v334_v30 }
 0x231   :  { %v466_v24 = vadd.f32 %v465_v19, %v464_v17  ;;  %v487_v36 = vadd.f32 %v486_v29, %v485_v25 }
 0x233   :  { %v467_v28 = vrot.slane %v466_v24, 1 }
 0x25f   :  { %s861_s27 = spop %860 }
 0x260   :  { %v298_v37 = vstv %s861_s27  ;;  %s863_s28 = spop %862 }
 0x261   :  { %v299_v39 = vmul.f32 %v298_v37, %v1099_v31  ;;  %s1106_s29 = smul.f32 %s863_s28, %s1076_s2  ;;  %s865_s30 = spop %864 }
 0x262   :  { %s344_s3 = smul.f32 %s865_s30, %s1076_s2 }
 0x263   :  { %v301_v44 = vmul.f32 %v300_v41, %v299_v39  ;;  %s345_s9 = smul.f32 %s1106_s29, %s1106_s29  ;;  %v428_v6 = vsel %vm427_vm9, %v235_v35, %v299_v39  ;;  %v362_v7 = vstv %s1106_s29  ;;  %v468_v35 = vadd.f32 %v467_v28, %v466_v24 }
 0x265   :  { %v302_v46 = vsub.f32 %v1111_v40, %v301_v44  ;;  %s346_s10 = ssub.f32 %s344_s3, %s345_s9 }
 0x267   :  { %s347_s1 = sadd.f32 1e-05, %s346_s10  ;;  %v433_v48 = vsel %vm427_vm9, %v238_v45, %v302_v46  ;;  %v523_v45 = vpop.xlane.xlu2 %522  ;;  %v545_v46 = vpop.xlane.xlu0 %544 }
 0x269   :  { %v348_v50 = vstv %s347_s1 }
 0x26a   :  { %913 = vrsqrt.f32 %v348_v50  ;;  %vm355_vm11 = vweird.f32 %v348_v50 }
 0x26f   :  { %v607_v10 = vpop.xlane.xlu2 %606 }
 0x270   :  { %v914_v54 = vpop.eup %913 }
 0x271   :  { %v350_v56 = vmul.f32 %v914_v54, %v348_v50  ;;  %vm356_vm10 = vweird.f32 %v914_v54  ;;  %v546_v50 = vrot.slane %v545_v46, 4 }
 0x272   :  { %vm357_vm12 = vmor %vm355_vm11, %vm356_vm10 }
 0x273   :  { %v351_v57 = vmul.f32 %v914_v54, %v350_v56  ;;  %v547_v53 = vadd.f32 %v546_v50, %v545_v46 }
 0x275   :  { %v352_v60 = vmul.f32 0.5, %v351_v57  ;;  %v548_v56 = vrot.slane %v547_v53, 2 }
 0x277   :  { %v353_v61 = vsub.f32 1.5, %v352_v60  ;;  %v549_v60 = vadd.f32 %v548_v56, %v547_v53 }
 0x279   :  { %v354_v2 = vmul.f32 %v914_v54, %v353_v61 }
 0x27b   :  { %v358_v34 = vsel %vm357_vm12, %v914_v54, %v354_v2  ;;  %v550_v2 = vrot.slane %v549_v60, 1 }
 0x27c   :  { %866 = vpush %v358_v34 }
 0x27d   :  { %868 = vpush %v375_v33 }
 0x27e   :  { %870 = vpush %v396_v3 }
 0x2ad   :  { %s867_s4 = spop %866 }
 0x2ae   :  { %v360_v4 = vstv %s867_s4  ;;  %s869_s11 = spop %868 }
 0x2af   :  { %v361_v5 = vmul.f32 %v360_v4, %v1099_v31  ;;  %s1126_s12 = smul.f32 %s869_s11, %s1076_s2  ;;  %s871_s13 = spop %870  ;;  %v551_v4 = vadd.f32 %v550_v2, %v549_v60 }
 0x2b0   :  { %s406_s14 = smul.f32 %s871_s13, %s1076_s2 }
 0x2b1   :  { %v363_v8 = vmul.f32 %v362_v7, %v361_v5  ;;  %s407_s15 = smul.f32 %s1126_s12, %s1126_s12  ;;  %v430_v9 = vsel %vm429_vm13, %v428_v6, %v361_v5  ;;  %v424_v39 = vstv %s1126_s12 }
 0x2b3   :  { %v364_v12 = vsub.f32 %v1111_v40, %v363_v8  ;;  %s408_s16 = ssub.f32 %s406_s14, %s407_s15 }
 0x2b5   :  { %s409_s17 = sadd.f32 1e-05, %s408_s16  ;;  %v434_v14 = vsel %vm429_vm13, %v433_v48, %v364_v12  ;;  %v524_v48 = vrot.slane %v523_v45, 4  ;;  %v608_v12 = vrot.slane %v607_v10, 4 }
 0x2b7   :  { %v410_v16 = vstv %s409_s17  ;;  %v525_v52 = vadd.f32 %v524_v48, %v523_v45  ;;  %v609_v15 = vadd.f32 %v608_v12, %v607_v10 }
 0x2b8   :  { %915 = vrsqrt.f32 %v410_v16  ;;  %vm417_vm15 = vweird.f32 %v410_v16 }
 0x2b9   :  { %v526_v54 = vrot.slane %v525_v52, 2  ;;  %v610_v18 = vrot.slane %v609_v15, 2 }
 0x2bb   :  { %v527_v59 = vadd.f32 %v526_v54, %v525_v52 }
 0x2bd   :  { %v528_v63 = vrot.slane %v527_v59, 1 }
 0x2be   :  { %v916_v20 = vpop.eup %915 }
 0x2bf   :  { %v412_v22 = vmul.f32 %v916_v20, %v410_v16  ;;  %vm418_vm14 = vweird.f32 %v916_v20  ;;  %v529_v3 = vadd.f32 %v528_v63, %v527_v59 }
 0x2c0   :  { %vm419_vm0 = vmor %vm417_vm15, %vm418_vm14 }
 0x2c1   :  { %v413_v23 = vmul.f32 %v916_v20, %v412_v22  ;;  %v611_v22 = vadd.f32 %v610_v18, %v609_v15 }
 0x2c3   :  { %v414_v26 = vmul.f32 0.5, %v413_v23 }
 0x2c5   :  { %v415_v27 = vsub.f32 1.5, %v414_v26  ;;  %v612_v26 = vrot.slane %v611_v22, 1 }
 0x2c7   :  { %v416_v30 = vmul.f32 %v916_v20, %v415_v27 }
 0x2c9   :  { %v420_v32 = vsel %vm419_vm0, %v916_v20, %v416_v30  ;;  %v613_v30 = vadd.f32 %v612_v26, %v611_v22  ;;  %v729_v26 = vld [vmem:[%s1204_s6] sm:$0xff] }
 0x2ca   :  { %872 = vpush %v420_v32 }
 0x2cb   :  { %874 = vpush %v468_v35 }
 0x2cc   :  { %876 = vpush %v487_v36 }
 0x2fb   :  { %s873_s18 = spop %872 }
 0x2fc   :  { %v422_v37 = vstv %s873_s18  ;;  %s875_s19 = spop %874 }
 0x2fd   :  { %v423_v38 = vmul.f32 %v422_v37, %v1099_v31  ;;  %s1138_s20 = smul.f32 %s875_s19, %s1076_s2  ;;  %s877_s21 = spop %876 }
 0x2fe   :  { %s497_s22 = smul.f32 %s877_s21, %s1076_s2 }
 0x2ff   :  { %v425_v41 = vmul.f32 %v424_v39, %v423_v38  ;;  %s498_s23 = smul.f32 %s1138_s20, %s1138_s20  ;;  %v432_v44 = vsel %vm431_vm1, %v430_v9, %v423_v38  ;;  %v515_v7 = vstv %s1138_s20  ;;  %v586_v9 = vpop.xlane.xlu1 %585  ;;  %v648_v39 = vpop.xlane.xlu0 %647 }
 0x300   :  { %438 = vperm.xlu1 %906, %v432_v44   ;;  %v587_v11 = vrot.slane %v586_v9, 4  ;;  %v649_v46 = vrot.slane %v648_v39, 4 }
 0x301   :  { %v426_v47 = vsub.f32 %v1111_v40, %v425_v41  ;;  %s499_s24 = ssub.f32 %s497_s22, %s498_s23 }
 0x303   :  { %s500_s25 = sadd.f32 1e-05, %s499_s24  ;;  %v1147_v49 = vsel %vm431_vm1, %v434_v14, %v426_v47  ;;  %v588_v14 = vadd.f32 %v587_v11, %v586_v9 }
 0x305   :  { %v501_v51 = vstv %s500_s25  ;;  %v589_v16 = vrot.slane %v588_v14, 2 }
 0x306   :  { %917 = vrsqrt.f32 %v501_v51  ;;  %vm508_vm3 = vweird.f32 %v501_v51 }
 0x307   :  { %v590_v21 = vadd.f32 %v589_v16, %v588_v14  ;;  %v669_v41 = vpop.xlane.xlu1 %668 }
 0x308   :  { %v670_v48 = vrot.slane %v669_v41, 4 }
 0x309   :  { %v591_v25 = vrot.slane %v590_v21, 1 }
 0x30a   :  { %v671_v52 = vadd.f32 %v670_v48, %v669_v41 }
 0x30b   :  { %v592_v29 = vadd.f32 %v591_v25, %v590_v21 }
 0x30c   :  { %v918_v55 = vpop.eup %917 }
 0x30d   :  { %v503_v57 = vmul.f32 %v918_v55, %v501_v51  ;;  %vm509_vm2 = vweird.f32 %v918_v55  ;;  %v650_v51 = vadd.f32 %v649_v46, %v648_v39 }
 0x30e   :  { %vm510_vm4 = vmor %vm508_vm3, %vm509_vm2 }
 0x30f   :  { %v504_v58 = vmul.f32 %v918_v55, %v503_v57  ;;  %v651_v53 = vrot.slane %v650_v51, 2 }
 0x311   :  { %v505_v61 = vmul.f32 0.5, %v504_v58  ;;  %v652_v58 = vadd.f32 %v651_v53, %v650_v51 }
 0x313   :  { %v506_v62 = vsub.f32 1.5, %v505_v61 }
 0x315   :  { %v507_v34 = vmul.f32 %v918_v55, %v506_v62  ;;  %v653_v62 = vrot.slane %v652_v58, 1 }
 0x317   :  { %v511_v33 = vsel %vm510_vm4, %v918_v55, %v507_v34  ;;  %v672_v55 = vrot.slane %v671_v52, 2 }
 0x318   :  { %878 = vpush %v511_v33  ;;  %v654_v33 = vadd.f32 %v653_v62, %v652_v58 }
 0x319   :  { %880 = vpush %v529_v3  ;;  %v673_v59 = vadd.f32 %v672_v55, %v671_v52 }
 0x31a   :  { %882 = vpush %v551_v4 }
 0x31b   :  { %v674_v63 = vrot.slane %v673_v59, 1 }
 0x31d   :  { %v675_v3 = vadd.f32 %v674_v63, %v673_v59 }
 0x349   :  { %s879_s26 = spop %878 }
 0x34a   :  { %v513_v5 = vstv %s879_s26  ;;  %s881_s27 = spop %880 }
 0x34b   :  { %v514_v6 = vmul.f32 %v513_v5, %v1099_v31  ;;  %s1151_s28 = smul.f32 %s881_s27, %s1076_s2  ;;  %s883_s29 = spop %882 }
 0x34c   :  { %s561_s30 = smul.f32 %s883_s29, %s1076_s2  ;;  %s830_s29 = sshll.u32 %s1205_s7, 4  ;;  %s831_s29 = int_to_ptr.hbm [resolvable:$true] %s830_s29 }
 0x34d   :  { %v516_v8 = vmul.f32 %v515_v7, %v514_v6  ;;  %s562_s0 = smul.f32 %s1151_s28, %s1151_s28  ;;  %v579_v36 = vstv %s1151_s28 }
 0x34f   :  { %s563_s8 = ssub.f32 %s561_s30, %s562_s0  ;;  %v517_v44 = vsub.f32 %v1111_v40, %v516_v8 }
 0x351   :  { %s564_s3 = sadd.f32 1e-05, %s563_s8 }
 0x353   :  { %v565_v13 = vstv %s564_s3 }
 0x354   :  { %919 = vrsqrt.f32 %v565_v13  ;;  %vm572_vm6 = vweird.f32 %v565_v13 }
 0x35a   :  { %v920_v17 = vpop.eup %919 }
 0x35b   :  { %v567_v19 = vmul.f32 %v920_v17, %v565_v13  ;;  %vm573_vm5 = vweird.f32 %v920_v17 }
 0x35c   :  { %vm574_vm7 = vmor %vm572_vm6, %vm573_vm5 }
 0x35d   :  { %v568_v20 = vmul.f32 %v920_v17, %v567_v19 }
 0x35f   :  { %v569_v23 = vmul.f32 0.5, %v568_v20 }
 0x361   :  { %v570_v24 = vsub.f32 1.5, %v569_v23 }
 0x363   :  { %v571_v27 = vmul.f32 %v920_v17, %v570_v24 }
 0x365   :  { %v575_v28 = vsel %vm574_vm7, %v920_v17, %v571_v27 }
 0x366   :  { %884 = vpush %v575_v28 }
 0x367   :  { %886 = vpush %v592_v29 }
 0x368   :  { %888 = vpush %v613_v30 }
 0x397   :  { %s885_s9 = spop %884 }
 0x398   :  { %v577_v32 = vstv %s885_s9  ;;  %s887_s10 = spop %886 }
 0x399   :  { %v578_v35 = vmul.f32 %v577_v32, %v1099_v31  ;;  %s1159_s1 = smul.f32 %s887_s10, %s1076_s2  ;;  %s889_s4 = spop %888 }
 0x39a   :  { %s623_s11 = smul.f32 %s889_s4, %s1076_s2 }
 0x39b   :  { %v580_v37 = vmul.f32 %v579_v36, %v578_v35  ;;  %v706_v38 = vsel %vm427_vm9, %v514_v6, %v578_v35  ;;  %s624_s12 = smul.f32 %s1159_s1, %s1159_s1  ;;  %v641_v6 = vstv %s1159_s1  ;;  %v728_v36 = vld [vmem:[%s1203_s5] sm:$0xff]  ;;  %s982_s5 = smov [#allocation5]  }
 0x39c   :  { %s828_s6 = sshll.u32 %s982_s5, 4  ;;  %s829_s6 = int_to_ptr.vmem [resolvable:$true] %s828_s6 }
 0x39d   :  { %v581_v45 = vsub.f32 %v1111_v40, %v580_v37  ;;  %s625_s13 = ssub.f32 %s623_s11, %s624_s12  ;;  %v439_v37 = vpop.permute.xlu1 %438 }
 0x39f   :  { %s626_s14 = sadd.f32 1e-05, %s625_s13  ;;  %v709_v47 = vsel %vm427_vm9, %v517_v44, %v581_v45 }
 0x3a1   :  { %v627_v50 = vstv %s626_s14 }
 0x3a2   :  { %921 = vrsqrt.f32 %v627_v50  ;;  %vm634_vm9 = vweird.f32 %v627_v50 }
 0x3a8   :  { %v922_v54 = vpop.eup %921 }
 0x3a9   :  { %v629_v56 = vmul.f32 %v922_v54, %v627_v50  ;;  %vm635_vm8 = vweird.f32 %v922_v54 }
 0x3aa   :  { %vm636_vm10 = vmor %vm634_vm9, %vm635_vm8 }
 0x3ab   :  { %v630_v57 = vmul.f32 %v922_v54, %v629_v56 }
 0x3ad   :  { %v631_v60 = vmul.f32 0.5, %v630_v57 }
 0x3af   :  { %v632_v61 = vsub.f32 1.5, %v631_v60 }
 0x3b1   :  { %v633_v2 = vmul.f32 %v922_v54, %v632_v61 }
 0x3b3   :  { %v637_v34 = vsel %vm636_vm10, %v922_v54, %v633_v2 }
 0x3b4   :  { %890 = vpush %v637_v34 }
 0x3b5   :  { %892 = vpush %v654_v33 }
 0x3b6   :  { %894 = vpush %v675_v3 }
 0x3e5   :  { %s891_s15 = spop %890 }
 0x3e6   :  { %v639_v4 = vstv %s891_s15  ;;  %s893_s16 = spop %892 }
 0x3e7   :  { %v640_v5 = vmul.f32 %v639_v4, %v1099_v31  ;;  %s664_s17 = smul.f32 %s893_s16, %s1076_s2  ;;  %s895_s18 = spop %894 }
 0x3e8   :  { %s685_s19 = smul.f32 %s895_s18, %s1076_s2 }
 0x3e9   :  { %v642_v7 = vmul.f32 %v641_v6, %v640_v5  ;;  %s686_s20 = smul.f32 %s664_s17, %s664_s17  ;;  %v707_v8 = vsel %vm429_vm13, %v706_v38, %v640_v5  ;;  %v703_v21 = vstv %s664_s17 }
 0x3eb   :  { %v643_v9 = vsub.f32 %v1111_v40, %v642_v7  ;;  %s687_s21 = ssub.f32 %s685_s19, %s686_s20 }
 0x3ed   :  { %s688_s22 = sadd.f32 1e-05, %s687_s21  ;;  %v710_v10 = vsel %vm429_vm13, %v709_v47, %v643_v9  ;;  %vm735_vm13 = vcmask 64512  }
 0x3ef   :  { %v689_v11 = vstv %s688_s22 }
 0x3f0   :  { %923 = vrsqrt.f32 %v689_v11  ;;  %vm696_vm12 = vweird.f32 %v689_v11 }
 0x3f6   :  { %v924_v12 = vpop.eup %923 }
 0x3f7   :  { %v691_v13 = vmul.f32 %v924_v12, %v689_v11  ;;  %vm697_vm11 = vweird.f32 %v924_v12 }
 0x3f8   :  { %vm698_vm14 = vmor %vm696_vm12, %vm697_vm11 }
 0x3f9   :  { %v692_v14 = vmul.f32 %v924_v12, %v691_v13 }
 0x3fb   :  { %v693_v15 = vmul.f32 0.5, %v692_v14 }
 0x3fd   :  { %v694_v16 = vsub.f32 1.5, %v693_v15 }
 0x3ff   :  { %v695_v17 = vmul.f32 %v924_v12, %v694_v16 }
 0x401   :  { %v699_v18 = vsel %vm698_vm14, %v924_v12, %v695_v17 }
 0x402   :  { %896 = vpush %v699_v18 }
 0x433   :  { %s897_s2 = spop %896 }
 0x434   :  { %v701_v19 = vstv %s897_s2 }
 0x435   :  { %v702_v20 = vmul.f32 %v701_v19, %v1099_v31 }
 0x437   :  { %v704_v22 = vmul.f32 %v703_v21, %v702_v20  ;;  %v708_v23 = vsel %vm431_vm1, %v707_v8, %v702_v20 }
 0x438   :  { %714 = vperm.xlu2 %905, %v708_v23  }
 0x439   :  { %v705_v24 = vsub.f32 %v1111_v40, %v704_v22 }
 0x43b   :  { %v711_v25 = vsel %vm431_vm1, %v710_v10, %v705_v24 }
 0x43c   :  { %721 = vperm.xlu0 %904, %v711_v25  }
 0x440   :  { %732 = vperm.xlu2 %905, %v729_v26  }
 0x444   :  { %445 = vperm.xlu0 %904, %v1147_v49  }
 0x492   :  { %v715_v27 = vpop.permute.xlu2 %714 }
 0x493   :  { %v717_v31 = vmul.f32 %v715_v27, %v1048_v0  ;;  %v718_v28 = vmul.f32 %v715_v27, %v1050_v1  ;;  %v441_v0 = vmul.f32 %v439_v37, %v1032_v42  ;;  %v442_v1 = vmul.f32 %v439_v37, %v1034_v43 }
 0x49a   :  { %v733_v45 = vpop.permute.xlu2 %732 }
 0x4ae   :  { %v722_v29 = vpop.permute.xlu0 %721 }
 0x4af   :  { %v724_v30 = vadd.f32 %v722_v29, %v717_v31  ;;  %v725_v32 = vadd.f32 %v722_v29, %v718_v28 }
 0x4b1   :  { %v726_v35 = vmax.f32 %v724_v30, 0.0  ;;  %v727_v40 = vmax.f32 %v725_v32, 0.0 }
 0x4b3   :  { %794 = vmatpush.msrb.mxu2 %v726_v35  ;;  %814 = vmatpush.msrb.mxu3 %v727_v40 }
 0x4b4   :  { %846 = vmatmul.msk.f32.vlgmr.msrb.gmra.mxu2 %vm735_vm13, %v728_v36  ;;  %847 = vmatmul.msk.f32.vlgmr.msrb.gmra.mxu3 %vm735_vm13, %v728_v36 }
 0x4b6   :  { %v446_v49 = vpop.permute.xlu0 %445 }
 0x4b7   :  { %v448_v38 = vadd.f32 %v446_v49, %v441_v0  ;;  %v449_v39 = vadd.f32 %v446_v49, %v442_v1 }
 0x4b9   :  { %v450_v41 = vmax.f32 %v448_v38, 0.0  ;;  %v451_v44 = vmax.f32 %v449_v39, 0.0 }
 0x4bb   :  { %754 = vmatpush.msrb.mxu0 %v450_v41  ;;  %774 = vmatpush.msrb.mxu1 %v451_v44 }
 0x4bc   :  { %844 = vmatmul.msk.f32.vlgmr.msrb.gmra.mxu0 %vm735_vm13, %v728_v36  ;;  %845 = vmatmul.msk.f32.vlgmr.msrb.gmra.mxu1 %vm735_vm13, %v728_v36 }
 0x537   :  { %v796_v46 = vpop.f32.mrf.mxu2  ;;  %v816_v47 = vpop.f32.mrf.mxu3 }
 0x538   :  { %v797_v48 = vadd.f32 %v796_v46, %v733_v45  ;;  %v817_v50 = vadd.f32 %v816_v47, %v733_v45 }
 0x539   :  { %v756_v42 = vpop.f32.mrf.mxu0  ;;  %v776_v43 = vpop.f32.mrf.mxu1 }
 0x53a   :  { %821 = vst [vmem:[#allocation5 + $0x10] sm:$0xff] %v797_v48  ;;  %v757_v51 = vadd.f32 %v756_v42, %v733_v45  ;;  %v777_v52 = vadd.f32 %v776_v43, %v733_v45 }
 0x53b   :  { %822 = vst [vmem:[#allocation5 + $0x18] sm:$0xff] %v817_v50 }
 0x53c   :  { %819 = vst [vmem:[#allocation5] sm:$0xff] %v757_v51 }
 0x53d   :  { %820 = vst [vmem:[#allocation5 + $0x8] sm:$0xff] %v777_v52 }
 0x53e   :  { %833 = dma.vmem_to_hbm [thread:$0]  %s829_s6, 512, %s831_s29, [#allocation4]  }
 0x53f   :  { %975 = dma.done.wait [#allocation4], 512  }
 0x540   :  { %976 = vsyncadd [#allocation4], 4294966784 }
 0x541   :  { %838 = vsyncpa [#allocation3], 1 }
 0x542   :  { %839 = vsyncpa [#allocation4], 1 }

</bundles_post_ra>
